<compile_context>
chip_gen: v5e
topology: v5e:2x2
jax: 0.10.0
libtpu: 0.0.40
codegen_flags: <defaults>
</compile_context>

<pallas_src>
import jax
import jax.numpy as jnp
from jax import lax
from jax.experimental import pallas as pl
from jax.experimental.pallas import tpu as pltpu

# Model hyperparameters (match the PyTorch module: input_size fixed to 300).
VOCAB = 50
VOCAB_PAD = 128          # pad vocab to a full lane tile for the one-hot contraction
EMBED_DIM = 300          # nn.LSTM(input_size=300, ...)
HIDDEN = 32              # hidden_size
NUM_CLASS = 8
SEQ_LEN = 8
BATCH = 2


def seq_classifier_kernel(tok_ref, proj_ref, w_hh_t_ref, w_fc_t_ref, b_fc_ref, out_ref):
    """tok: (T*B, 1) int32 (row-major over (T, B));
    proj: (Vpad, 4H) = emb @ w_ih.T + (b_ih + b_hh), zero-padded rows V..Vpad;
    w_hh_t: (H, 4H); w_fc_t: (H, C); b_fc: (1, C); out: (B, C) log-probs."""
    TB = tok_ref.shape[0]
    B = out_ref.shape[0]
    T = TB // B
    H = w_hh_t_ref.shape[0]
    Vp = proj_ref.shape[0]

    # ---- fused embedding + input projection + bias: one full-lane MXU matmul ----
    tok = tok_ref[...]                                                   # (T*B, 1) int32
    onehot = (tok == lax.broadcasted_iota(jnp.int32, (TB, Vp), 1)).astype(jnp.float32)
    x_proj = jnp.dot(onehot, proj_ref[...],
                     preferred_element_type=jnp.float32)                 # (T*B, 4H)
    # Per-step blocks; independent of the recurrence state, so off the serial chain.
    x_steps = [x_proj[t * B:(t + 1) * B, :] for t in range(T)]

    w_hh_t = w_hh_t_ref[...]                                             # (H, 4H)

    # ---- unrolled LSTM recurrence (PyTorch gate order: i, f, g, o) ----
    h = jnp.zeros((B, H), jnp.float32)
    c = jnp.zeros((B, H), jnp.float32)
    for t in range(T):   # T is a compile-time constant -> static unroll
        gates = x_steps[t] + jnp.dot(h, w_hh_t,
                                     preferred_element_type=jnp.float32)  # (B, 4H)
        # 2 whole-vreg EUP ops instead of 4 sliced ones; wasted lanes are free.
        sig = jax.nn.sigmoid(gates)
        tnh = jnp.tanh(gates)
        i = sig[:, 0:H]
        f = sig[:, H:2 * H]
        g = tnh[:, 2 * H:3 * H]
        o = sig[:, 3 * H:4 * H]
        c = f * c + i * g
        h = o * jnp.tanh(c)

    # ---- fc + log_softmax ----
    logits = jnp.dot(h, w_fc_t_ref[...],
                     preferred_element_type=jnp.float32) + b_fc_ref[...]  # (B, C)
    m = jnp.max(logits, axis=-1, keepdims=True)
    shifted = logits - m
    lse = jnp.log(jnp.sum(jnp.exp(shifted), axis=-1, keepdims=True))
    out_ref[...] = shifted - lse


def seq_classifier_forward(tokens, params):
    """tokens: int32 (T, B). Returns (B, NUM_CLASS) float32 log-probs."""
    T, B = tokens.shape
    emb = params["embeddings"].astype(jnp.float32)                  # (V, D)
    w_ih = params["w_ih"].astype(jnp.float32)                       # (4H, D)
    bias = (params["b_ih"] + params["b_hh"]).astype(jnp.float32)    # (4H,)
    # Algebraic fold of gather + input projection + bias (both linear): (V, 4H).
    proj_table = emb @ w_ih.T + bias[None, :]
    proj_table = jnp.pad(proj_table, ((0, VOCAB_PAD - VOCAB), (0, 0)))  # (Vpad, 4H)
    w_hh_t = params["w_hh"].T.astype(jnp.float32)                   # (H, 4H)
    w_fc_t = params["w_fc"].T.astype(jnp.float32)                   # (H, C)
    b_fc = params["b_fc"].astype(jnp.float32).reshape(1, -1)        # (1, C)
    # Row-major flatten over (T, B): index t*B + b == tokens[t, b].
    tok = tokens.reshape(T * B, 1).astype(jnp.int32)

    H4 = 4 * HIDDEN
    flops = (2 * T * B * (VOCAB_PAD * H4          # folded one-hot @ proj_table
                          + HIDDEN * H4)          # recurrent matmuls
             + 2 * B * HIDDEN * NUM_CLASS)        # fc
    transcendentals = T * B * (2 * H4 + HIDDEN) + B * (NUM_CLASS + 1)
    bytes_accessed = 4 * (tok.size + proj_table.size + w_hh_t.size
                          + w_fc_t.size + b_fc.size + B * NUM_CLASS)

    vmem = pl.BlockSpec(memory_space=pltpu.MemorySpace.VMEM)
    return pl.pallas_call(
        seq_classifier_kernel,
        out_shape=jax.ShapeDtypeStruct((B, NUM_CLASS), jnp.float32),
        in_specs=[vmem] * 5,
        out_specs=vmem,
        cost_estimate=pl.CostEstimate(flops=flops,
                                      transcendentals=transcendentals,
                                      bytes_accessed=bytes_accessed),
    )(tok, proj_table, w_hh_t, w_fc_t, b_fc)


def reference_forward(tokens, params):
    """Pure-JAX reference mirroring PyTorch semantics (correctness check)."""
    x = jnp.take(params["embeddings"], tokens, axis=0).astype(jnp.float32)  # (T, B, D)
    H = HIDDEN
    h = jnp.zeros((tokens.shape[1], H), jnp.float32)
    c = jnp.zeros((tokens.shape[1], H), jnp.float32)
    for t in range(tokens.shape[0]):
        gates = x[t] @ params["w_ih"].T + params["b_ih"] + h @ params["w_hh"].T + params["b_hh"]
        i = jax.nn.sigmoid(gates[:, 0:H])
        f = jax.nn.sigmoid(gates[:, H:2 * H])
        g = jnp.tanh(gates[:, 2 * H:3 * H])
        o = jax.nn.sigmoid(gates[:, 3 * H:4 * H])
        c = f * c + i * g
        h = o * jnp.tanh(c)
    logits = h @ params["w_fc"].T + params["b_fc"]
    return jax.nn.log_softmax(logits, axis=-1)


def init_params(key):
    ks = jax.random.split(key, 7)
    scale = 0.1
    return {
        "embeddings": scale * jax.random.normal(ks[0], (VOCAB, EMBED_DIM), jnp.float32),
        "w_ih": scale * jax.random.normal(ks[1], (4 * HIDDEN, EMBED_DIM), jnp.float32),
        "w_hh": scale * jax.random.normal(ks[2], (4 * HIDDEN, HIDDEN), jnp.float32),
        "b_ih": scale * jax.random.normal(ks[3], (4 * HIDDEN,), jnp.float32),
        "b_hh": scale * jax.random.normal(ks[4], (4 * HIDDEN,), jnp.float32),
        "w_fc": scale * jax.random.normal(ks[5], (NUM_CLASS, HIDDEN), jnp.float32),
        "b_fc": scale * jax.random.normal(ks[6], (NUM_CLASS,), jnp.float32),
    }


if __name__ == "__main__":
    key = jax.random.PRNGKey(0)
    pkey, tkey = jax.random.split(key)
    params = init_params(pkey)
    tokens = jax.random.randint(tkey, (SEQ_LEN, BATCH), 0, VOCAB, dtype=jnp.int32)

    out = seq_classifier_forward(tokens, params)
    out = jax.block_until_ready(out)

    ref = reference_forward(tokens, params)
    assert out.shape == (BATCH, NUM_CLASS)
    assert jnp.allclose(out, ref, atol=1e-4, rtol=1e-4), (out, ref)
    # TODO(synk): dropout is inactive (num_layers=1 / eval-mode forward), so it is not modeled.
    print("KERNEL_OK")
</pallas_src>

<mosaic_0001>
module attributes {stable_mosaic.version = 11 : i64} {
  func.func @seq_classifier_kernel(%arg0: memref<16x1xi32, #tpu.memory_space<vmem>>, %arg1: memref<128x128xf32, #tpu.memory_space<vmem>>, %arg2: memref<32x128xf32, #tpu.memory_space<vmem>>, %arg3: memref<32x8xf32, #tpu.memory_space<vmem>>, %arg4: memref<1x8xf32, #tpu.memory_space<vmem>>, %arg5: memref<2x8xf32, #tpu.memory_space<vmem>>) attributes {dimension_semantics = [], scalar_prefetch = 0 : i64, scratch_operands = 0 : i64, tpu.core_type = #tpu.core_type<tc>} {
    %c0 = arith.constant 0 : index
    %c0_0 = arith.constant 0 : index
    %0 = vector.load %arg0[%c0, %c0_0] : memref<16x1xi32, #tpu.memory_space<vmem>>, vector<16x1xi32>
    %1 = tpu.iota {dimensions = array<i32: 1>} : vector<16x128xi32>
    %2 = vector.broadcast %0 : vector<16x1xi32> to vector<16x128xi32>
    %3 = arith.cmpi eq, %2, %1 : vector<16x128xi32>
    %4 = arith.extui %3 : vector<16x128xi1> to vector<16x128xi32>
    %5 = arith.sitofp %4 : vector<16x128xi32> to vector<16x128xf32>
    %c0_1 = arith.constant 0 : index
    %c0_2 = arith.constant 0 : index
    %6 = vector.load %arg1[%c0_1, %c0_2] : memref<128x128xf32, #tpu.memory_space<vmem>>, vector<128x128xf32>
    %cst = arith.constant dense<0.000000e+00> : vector<16x128xf32>
    %7 = tpu.matmul %5, %6, %cst {dimension_numbers = #tpu.dot_dimension_numbers<[1], [0], [0], [1], [0, 0, 1, 1], [], []>} : vector<16x128xf32>, vector<128x128xf32>, vector<16x128xf32> -> vector<16x128xf32>
    %8 = vector.extract_strided_slice %7 {offsets = [0, 0], sizes = [2, 128], strides = [1, 1]} : vector<16x128xf32> to vector<2x128xf32>
    %9 = vector.extract_strided_slice %7 {offsets = [2, 0], sizes = [2, 128], strides = [1, 1]} : vector<16x128xf32> to vector<2x128xf32>
    %10 = vector.extract_strided_slice %7 {offsets = [4, 0], sizes = [2, 128], strides = [1, 1]} : vector<16x128xf32> to vector<2x128xf32>
    %11 = vector.extract_strided_slice %7 {offsets = [6, 0], sizes = [2, 128], strides = [1, 1]} : vector<16x128xf32> to vector<2x128xf32>
    %12 = vector.extract_strided_slice %7 {offsets = [8, 0], sizes = [2, 128], strides = [1, 1]} : vector<16x128xf32> to vector<2x128xf32>
    %13 = vector.extract_strided_slice %7 {offsets = [10, 0], sizes = [2, 128], strides = [1, 1]} : vector<16x128xf32> to vector<2x128xf32>
    %14 = vector.extract_strided_slice %7 {offsets = [12, 0], sizes = [2, 128], strides = [1, 1]} : vector<16x128xf32> to vector<2x128xf32>
    %15 = vector.extract_strided_slice %7 {offsets = [14, 0], sizes = [2, 128], strides = [1, 1]} : vector<16x128xf32> to vector<2x128xf32>
    %c0_3 = arith.constant 0 : index
    %c0_4 = arith.constant 0 : index
    %16 = vector.load %arg2[%c0_3, %c0_4] : memref<32x128xf32, #tpu.memory_space<vmem>>, vector<32x128xf32>
    %cst_5 = arith.constant 0.000000e+00 : f32
    %17 = vector.broadcast %cst_5 : f32 to vector<2x32xf32>
    %cst_6 = arith.constant 0.000000e+00 : f32
    %18 = vector.broadcast %cst_6 : f32 to vector<2x32xf32>
    %cst_7 = arith.constant dense<0.000000e+00> : vector<2x128xf32>
    %19 = tpu.matmul %17, %16, %cst_7 {dimension_numbers = #tpu.dot_dimension_numbers<[1], [0], [0], [1], [0, 0, 1, 1], [], []>} : vector<2x32xf32>, vector<32x128xf32>, vector<2x128xf32> -> vector<2x128xf32>
    %20 = arith.addf %8, %19 : vector<2x128xf32>
    %21 = arith.negf %20 : vector<2x128xf32>
    %22 = math.exp %21 : vector<2x128xf32>
    %cst_8 = arith.constant 1.000000e+00 : f32
    %23 = vector.broadcast %cst_8 : f32 to vector<2x128xf32>
    %24 = arith.addf %23, %22 : vector<2x128xf32>
    %25 = arith.divf %23, %24 : vector<2x128xf32>
    %26 = math.tanh %20 : vector<2x128xf32>
    %27 = vector.extract_strided_slice %25 {offsets = [0, 0], sizes = [2, 32], strides = [1, 1]} : vector<2x128xf32> to vector<2x32xf32>
    %28 = vector.extract_strided_slice %25 {offsets = [0, 32], sizes = [2, 32], strides = [1, 1]} : vector<2x128xf32> to vector<2x32xf32>
    %29 = vector.extract_strided_slice %26 {offsets = [0, 64], sizes = [2, 32], strides = [1, 1]} : vector<2x128xf32> to vector<2x32xf32>
    %30 = vector.extract_strided_slice %25 {offsets = [0, 96], sizes = [2, 32], strides = [1, 1]} : vector<2x128xf32> to vector<2x32xf32>
    %31 = arith.mulf %28, %18 : vector<2x32xf32>
    %32 = arith.mulf %27, %29 : vector<2x32xf32>
    %33 = arith.addf %31, %32 : vector<2x32xf32>
    %34 = math.tanh %33 : vector<2x32xf32>
    %35 = arith.mulf %30, %34 : vector<2x32xf32>
    %cst_9 = arith.constant dense<0.000000e+00> : vector<2x128xf32>
    %36 = tpu.matmul %35, %16, %cst_9 {dimension_numbers = #tpu.dot_dimension_numbers<[1], [0], [0], [1], [0, 0, 1, 1], [], []>} : vector<2x32xf32>, vector<32x128xf32>, vector<2x128xf32> -> vector<2x128xf32>
    %37 = arith.addf %9, %36 : vector<2x128xf32>
    %38 = arith.negf %37 : vector<2x128xf32>
    %39 = math.exp %38 : vector<2x128xf32>
    %cst_10 = arith.constant 1.000000e+00 : f32
    %40 = vector.broadcast %cst_10 : f32 to vector<2x128xf32>
    %41 = arith.addf %40, %39 : vector<2x128xf32>
    %42 = arith.divf %40, %41 : vector<2x128xf32>
    %43 = math.tanh %37 : vector<2x128xf32>
    %44 = vector.extract_strided_slice %42 {offsets = [0, 0], sizes = [2, 32], strides = [1, 1]} : vector<2x128xf32> to vector<2x32xf32>
    %45 = vector.extract_strided_slice %42 {offsets = [0, 32], sizes = [2, 32], strides = [1, 1]} : vector<2x128xf32> to vector<2x32xf32>
    %46 = vector.extract_strided_slice %43 {offsets = [0, 64], sizes = [2, 32], strides = [1, 1]} : vector<2x128xf32> to vector<2x32xf32>
    %47 = vector.extract_strided_slice %42 {offsets = [0, 96], sizes = [2, 32], strides = [1, 1]} : vector<2x128xf32> to vector<2x32xf32>
    %48 = arith.mulf %45, %33 : vector<2x32xf32>
    %49 = arith.mulf %44, %46 : vector<2x32xf32>
    %50 = arith.addf %48, %49 : vector<2x32xf32>
    %51 = math.tanh %50 : vector<2x32xf32>
    %52 = arith.mulf %47, %51 : vector<2x32xf32>
    %cst_11 = arith.constant dense<0.000000e+00> : vector<2x128xf32>
    %53 = tpu.matmul %52, %16, %cst_11 {dimension_numbers = #tpu.dot_dimension_numbers<[1], [0], [0], [1], [0, 0, 1, 1], [], []>} : vector<2x32xf32>, vector<32x128xf32>, vector<2x128xf32> -> vector<2x128xf32>
    %54 = arith.addf %10, %53 : vector<2x128xf32>
    %55 = arith.negf %54 : vector<2x128xf32>
    %56 = math.exp %55 : vector<2x128xf32>
    %cst_12 = arith.constant 1.000000e+00 : f32
    %57 = vector.broadcast %cst_12 : f32 to vector<2x128xf32>
    %58 = arith.addf %57, %56 : vector<2x128xf32>
    %59 = arith.divf %57, %58 : vector<2x128xf32>
    %60 = math.tanh %54 : vector<2x128xf32>
    %61 = vector.extract_strided_slice %59 {offsets = [0, 0], sizes = [2, 32], strides = [1, 1]} : vector<2x128xf32> to vector<2x32xf32>
    %62 = vector.extract_strided_slice %59 {offsets = [0, 32], sizes = [2, 32], strides = [1, 1]} : vector<2x128xf32> to vector<2x32xf32>
    %63 = vector.extract_strided_slice %60 {offsets = [0, 64], sizes = [2, 32], strides = [1, 1]} : vector<2x128xf32> to vector<2x32xf32>
    %64 = vector.extract_strided_slice %59 {offsets = [0, 96], sizes = [2, 32], strides = [1, 1]} : vector<2x128xf32> to vector<2x32xf32>
    %65 = arith.mulf %62, %50 : vector<2x32xf32>
    %66 = arith.mulf %61, %63 : vector<2x32xf32>
    %67 = arith.addf %65, %66 : vector<2x32xf32>
    %68 = math.tanh %67 : vector<2x32xf32>
    %69 = arith.mulf %64, %68 : vector<2x32xf32>
    %cst_13 = arith.constant dense<0.000000e+00> : vector<2x128xf32>
    %70 = tpu.matmul %69, %16, %cst_13 {dimension_numbers = #tpu.dot_dimension_numbers<[1], [0], [0], [1], [0, 0, 1, 1], [], []>} : vector<2x32xf32>, vector<32x128xf32>, vector<2x128xf32> -> vector<2x128xf32>
    %71 = arith.addf %11, %70 : vector<2x128xf32>
    %72 = arith.negf %71 : vector<2x128xf32>
    %73 = math.exp %72 : vector<2x128xf32>
    %cst_14 = arith.constant 1.000000e+00 : f32
    %74 = vector.broadcast %cst_14 : f32 to vector<2x128xf32>
    %75 = arith.addf %74, %73 : vector<2x128xf32>
    %76 = arith.divf %74, %75 : vector<2x128xf32>
    %77 = math.tanh %71 : vector<2x128xf32>
    %78 = vector.extract_strided_slice %76 {offsets = [0, 0], sizes = [2, 32], strides = [1, 1]} : vector<2x128xf32> to vector<2x32xf32>
    %79 = vector.extract_strided_slice %76 {offsets = [0, 32], sizes = [2, 32], strides = [1, 1]} : vector<2x128xf32> to vector<2x32xf32>
    %80 = vector.extract_strided_slice %77 {offsets = [0, 64], sizes = [2, 32], strides = [1, 1]} : vector<2x128xf32> to vector<2x32xf32>
    %81 = vector.extract_strided_slice %76 {offsets = [0, 96], sizes = [2, 32], strides = [1, 1]} : vector<2x128xf32> to vector<2x32xf32>
    %82 = arith.mulf %79, %67 : vector<2x32xf32>
    %83 = arith.mulf %78, %80 : vector<2x32xf32>
    %84 = arith.addf %82, %83 : vector<2x32xf32>
    %85 = math.tanh %84 : vector<2x32xf32>
    %86 = arith.mulf %81, %85 : vector<2x32xf32>
    %cst_15 = arith.constant dense<0.000000e+00> : vector<2x128xf32>
    %87 = tpu.matmul %86, %16, %cst_15 {dimension_numbers = #tpu.dot_dimension_numbers<[1], [0], [0], [1], [0, 0, 1, 1], [], []>} : vector<2x32xf32>, vector<32x128xf32>, vector<2x128xf32> -> vector<2x128xf32>
    %88 = arith.addf %12, %87 : vector<2x128xf32>
    %89 = arith.negf %88 : vector<2x128xf32>
    %90 = math.exp %89 : vector<2x128xf32>
    %cst_16 = arith.constant 1.000000e+00 : f32
    %91 = vector.broadcast %cst_16 : f32 to vector<2x128xf32>
    %92 = arith.addf %91, %90 : vector<2x128xf32>
    %93 = arith.divf %91, %92 : vector<2x128xf32>
    %94 = math.tanh %88 : vector<2x128xf32>
    %95 = vector.extract_strided_slice %93 {offsets = [0, 0], sizes = [2, 32], strides = [1, 1]} : vector<2x128xf32> to vector<2x32xf32>
    %96 = vector.extract_strided_slice %93 {offsets = [0, 32], sizes = [2, 32], strides = [1, 1]} : vector<2x128xf32> to vector<2x32xf32>
    %97 = vector.extract_strided_slice %94 {offsets = [0, 64], sizes = [2, 32], strides = [1, 1]} : vector<2x128xf32> to vector<2x32xf32>
    %98 = vector.extract_strided_slice %93 {offsets = [0, 96], sizes = [2, 32], strides = [1, 1]} : vector<2x128xf32> to vector<2x32xf32>
    %99 = arith.mulf %96, %84 : vector<2x32xf32>
    %100 = arith.mulf %95, %97 : vector<2x32xf32>
    %101 = arith.addf %99, %100 : vector<2x32xf32>
    %102 = math.tanh %101 : vector<2x32xf32>
    %103 = arith.mulf %98, %102 : vector<2x32xf32>
    %cst_17 = arith.constant dense<0.000000e+00> : vector<2x128xf32>
    %104 = tpu.matmul %103, %16, %cst_17 {dimension_numbers = #tpu.dot_dimension_numbers<[1], [0], [0], [1], [0, 0, 1, 1], [], []>} : vector<2x32xf32>, vector<32x128xf32>, vector<2x128xf32> -> vector<2x128xf32>
    %105 = arith.addf %13, %104 : vector<2x128xf32>
    %106 = arith.negf %105 : vector<2x128xf32>
    %107 = math.exp %106 : vector<2x128xf32>
    %cst_18 = arith.constant 1.000000e+00 : f32
    %108 = vector.broadcast %cst_18 : f32 to vector<2x128xf32>
    %109 = arith.addf %108, %107 : vector<2x128xf32>
    %110 = arith.divf %108, %109 : vector<2x128xf32>
    %111 = math.tanh %105 : vector<2x128xf32>
    %112 = vector.extract_strided_slice %110 {offsets = [0, 0], sizes = [2, 32], strides = [1, 1]} : vector<2x128xf32> to vector<2x32xf32>
    %113 = vector.extract_strided_slice %110 {offsets = [0, 32], sizes = [2, 32], strides = [1, 1]} : vector<2x128xf32> to vector<2x32xf32>
    %114 = vector.extract_strided_slice %111 {offsets = [0, 64], sizes = [2, 32], strides = [1, 1]} : vector<2x128xf32> to vector<2x32xf32>
    %115 = vector.extract_strided_slice %110 {offsets = [0, 96], sizes = [2, 32], strides = [1, 1]} : vector<2x128xf32> to vector<2x32xf32>
    %116 = arith.mulf %113, %101 : vector<2x32xf32>
    %117 = arith.mulf %112, %114 : vector<2x32xf32>
    %118 = arith.addf %116, %117 : vector<2x32xf32>
    %119 = math.tanh %118 : vector<2x32xf32>
    %120 = arith.mulf %115, %119 : vector<2x32xf32>
    %cst_19 = arith.constant dense<0.000000e+00> : vector<2x128xf32>
    %121 = tpu.matmul %120, %16, %cst_19 {dimension_numbers = #tpu.dot_dimension_numbers<[1], [0], [0], [1], [0, 0, 1, 1], [], []>} : vector<2x32xf32>, vector<32x128xf32>, vector<2x128xf32> -> vector<2x128xf32>
    %122 = arith.addf %14, %121 : vector<2x128xf32>
    %123 = arith.negf %122 : vector<2x128xf32>
    %124 = math.exp %123 : vector<2x128xf32>
    %cst_20 = arith.constant 1.000000e+00 : f32
    %125 = vector.broadcast %cst_20 : f32 to vector<2x128xf32>
    %126 = arith.addf %125, %124 : vector<2x128xf32>
    %127 = arith.divf %125, %126 : vector<2x128xf32>
    %128 = math.tanh %122 : vector<2x128xf32>
    %129 = vector.extract_strided_slice %127 {offsets = [0, 0], sizes = [2, 32], strides = [1, 1]} : vector<2x128xf32> to vector<2x32xf32>
    %130 = vector.extract_strided_slice %127 {offsets = [0, 32], sizes = [2, 32], strides = [1, 1]} : vector<2x128xf32> to vector<2x32xf32>
    %131 = vector.extract_strided_slice %128 {offsets = [0, 64], sizes = [2, 32], strides = [1, 1]} : vector<2x128xf32> to vector<2x32xf32>
    %132 = vector.extract_strided_slice %127 {offsets = [0, 96], sizes = [2, 32], strides = [1, 1]} : vector<2x128xf32> to vector<2x32xf32>
    %133 = arith.mulf %130, %118 : vector<2x32xf32>
    %134 = arith.mulf %129, %131 : vector<2x32xf32>
    %135 = arith.addf %133, %134 : vector<2x32xf32>
    %136 = math.tanh %135 : vector<2x32xf32>
    %137 = arith.mulf %132, %136 : vector<2x32xf32>
    %cst_21 = arith.constant dense<0.000000e+00> : vector<2x128xf32>
    %138 = tpu.matmul %137, %16, %cst_21 {dimension_numbers = #tpu.dot_dimension_numbers<[1], [0], [0], [1], [0, 0, 1, 1], [], []>} : vector<2x32xf32>, vector<32x128xf32>, vector<2x128xf32> -> vector<2x128xf32>
    %139 = arith.addf %15, %138 : vector<2x128xf32>
    %140 = arith.negf %139 : vector<2x128xf32>
    %141 = math.exp %140 : vector<2x128xf32>
    %cst_22 = arith.constant 1.000000e+00 : f32
    %142 = vector.broadcast %cst_22 : f32 to vector<2x128xf32>
    %143 = arith.addf %142, %141 : vector<2x128xf32>
    %144 = arith.divf %142, %143 : vector<2x128xf32>
    %145 = math.tanh %139 : vector<2x128xf32>
    %146 = vector.extract_strided_slice %144 {offsets = [0, 0], sizes = [2, 32], strides = [1, 1]} : vector<2x128xf32> to vector<2x32xf32>
    %147 = vector.extract_strided_slice %144 {offsets = [0, 32], sizes = [2, 32], strides = [1, 1]} : vector<2x128xf32> to vector<2x32xf32>
    %148 = vector.extract_strided_slice %145 {offsets = [0, 64], sizes = [2, 32], strides = [1, 1]} : vector<2x128xf32> to vector<2x32xf32>
    %149 = vector.extract_strided_slice %144 {offsets = [0, 96], sizes = [2, 32], strides = [1, 1]} : vector<2x128xf32> to vector<2x32xf32>
    %150 = arith.mulf %147, %135 : vector<2x32xf32>
    %151 = arith.mulf %146, %148 : vector<2x32xf32>
    %152 = arith.addf %150, %151 : vector<2x32xf32>
    %153 = math.tanh %152 : vector<2x32xf32>
    %154 = arith.mulf %149, %153 : vector<2x32xf32>
    %c0_23 = arith.constant 0 : index
    %c0_24 = arith.constant 0 : index
    %155 = vector.load %arg3[%c0_23, %c0_24] : memref<32x8xf32, #tpu.memory_space<vmem>>, vector<32x8xf32>
    %cst_25 = arith.constant dense<0.000000e+00> : vector<2x8xf32>
    %156 = tpu.matmul %154, %155, %cst_25 {dimension_numbers = #tpu.dot_dimension_numbers<[1], [0], [0], [1], [0, 0, 1, 1], [], []>} : vector<2x32xf32>, vector<32x8xf32>, vector<2x8xf32> -> vector<2x8xf32>
    %c0_26 = arith.constant 0 : index
    %c0_27 = arith.constant 0 : index
    %157 = vector.load %arg4[%c0_26, %c0_27] : memref<1x8xf32, #tpu.memory_space<vmem>>, vector<1x8xf32>
    %158 = vector.broadcast %157 : vector<1x8xf32> to vector<2x8xf32>
    %159 = arith.addf %156, %158 : vector<2x8xf32>
    %cst_28 = arith.constant dense<0xFF800000> : vector<2xf32>
    %160 = vector.multi_reduction <maximumf>, %159, %cst_28 [1] : vector<2x8xf32> to vector<2xf32>
    %161 = vector.shape_cast %160 : vector<2xf32> to vector<2x1xf32>
    %162 = vector.broadcast %161 : vector<2x1xf32> to vector<2x8xf32>
    %163 = arith.subf %159, %162 : vector<2x8xf32>
    %164 = math.exp %163 : vector<2x8xf32>
    %cst_29 = arith.constant dense<0.000000e+00> : vector<2xf32>
    %165 = vector.multi_reduction <add>, %164, %cst_29 [1] : vector<2x8xf32> to vector<2xf32>
    %166 = vector.shape_cast %165 : vector<2xf32> to vector<2x1xf32>
    %167 = math.log %166 : vector<2x1xf32>
    %168 = vector.broadcast %167 : vector<2x1xf32> to vector<2x8xf32>
    %169 = arith.subf %163, %168 : vector<2x8xf32>
    %c0_30 = arith.constant 0 : index
    %c0_31 = arith.constant 0 : index
    %170 = vector.load %arg5[%c0_30, %c0_31] : memref<2x8xf32, #tpu.memory_space<vmem>>, vector<2x8xf32>
    tpu.vector_store %arg5[%c0_30, %c0_31], %169 {strides = array<i32>} : memref<2x8xf32, #tpu.memory_space<vmem>>, vector<2x8xf32>,
    return
  }
}

</mosaic_0001>

<bundles_post_ra>
// kernel: tpu_custom_call.1
= control target key start
LH: loop header
LB: loop body
LE: loop exit
PB: predicated region body
PF: predicated region fallthrough
CT: control target
= control target key end

     0   :  { %10 = vsyncpa [#allocation3], 0  ;;  %s1039_s0 = inlined_call_operand.vmem [shape: s32[16,1], index: 0, kind: input, shape index: {}]   ;;  %s1040_s1 = inlined_call_operand.hbm [shape: f32[128,128], index: 1, kind: input, shape index: {}]   ;;  %s1041_s2 = inlined_call_operand.vmem [shape: f32[32,128], index: 2, kind: input, shape index: {}]   ;;  %s1042_s3 = inlined_call_operand.vmem [shape: f32[32,8], index: 3, kind: input, shape index: {}]   ;;  %s1043_s4 = inlined_call_operand.vmem [shape: f32[1,8], index: 4, kind: input, shape index: {}]   ;;  %s1044_s5 = inlined_call_operand.hbm [shape: f32[2,8], index: 5, kind: output, shape index: {}]  }
   0x1   :  { %11 = vsyncpa [#allocation4], 0  ;;  %s18_s20 = sshll.u32 %s1040_s1, 4  ;;  %s860_s21 = smov [#allocation2]   ;;  %s19_s20 = int_to_ptr.hbm [resolvable:$true] %s18_s20 }
   0x2   :  { %s20_s22 = sshll.u32 %s860_s21, 4  ;;  %s861_s23 = smov 128   ;;  %s21_s22 = int_to_ptr.vmem [resolvable:$true] %s20_s22 }
   0x3   :  { %s862_s24 = smov 8  }
   0x4   :  { %26 = dma.hbm_to_vmem [thread:$0]  %s19_s20, 2048, %s21_s22, [#allocation3], %s861_s23, %s861_s23, %s862_s24  }
   0x5   :  { %856 = dma.done.wait [#allocation3], 2048  }
   0x6   :  { %857 = vsyncadd [#allocation3], 4294965248  ;;  %v863_v0 = vmov 0   ;;  %v37_v1 = vld [vmem:[%s1039_s0] sm:$0xff]  ;;  %v68_v2 = vld [vmem:[#allocation2 + $0x78] sm:$0xff]  ;;  %v864_v22 = vmov 0.0   ;;  %v39_v23 = vlaneseq }
   0x7   :  { %737 = vset.pattern.permute.xlu0 %v863_v0  ;;  %738 = vset.pattern.permute.xlu2 %v863_v0  ;;  %v67_v3 = vld [vmem:[#allocation2 + $0x70] sm:$0xff]  ;;  %v66_v4 = vld [vmem:[#allocation2 + $0x68] sm:$0xff]  ;;  %v65_v5 = vld [vmem:[#allocation2 + $0x60] sm:$0xff]  ;;  %v865_v26 = vmov 1.0   ;;  %s867_s9 = smov 32   ;;  %vm96_vm5 = vcmask 261120  }
   0x8   :  { %42 = vperm.xlu0 %737, %v37_v1   ;;  %69 = vmatpush.msra.mxu0 %v68_v2  ;;  %v908_v6 = vld [vmem:[%s1041_s2 + $0x18] sm:$0xff]  ;;  %v914_v7 = vld [vmem:[%s1041_s2 + $0x10] sm:$0xff]  ;;  %v919_v9 = vld [vmem:[%s1041_s2 + $0x8] sm:$0xff]  ;;  %v953_v24 = vand.u32 127, %v39_v23  ;;  %s698_s23 = sshll.u32 %s1044_s5, 4  ;;  %s699_s23 = int_to_ptr.hbm [resolvable:$true] %s698_s23 }
   0x9   :  { %112 = vmatpush.msra.mxu1 %v908_v6  ;;  %v64_v8 = vld [vmem:[#allocation2 + $0x58] sm:$0xff]  ;;  %175 = vmatpush.msra.mxu2 %v908_v6  ;;  %v63_v10 = vld [vmem:[#allocation2 + $0x50] sm:$0xff]  ;;  %v62_v11 = vld [vmem:[#allocation2 + $0x48] sm:$0xff] }
   0xa   :  { %70 = vmatpush.msra.mxu0 %v67_v3  ;;  %245 = vmatpush.msra.mxu3 %v908_v6  ;;  %v61_v12 = vld [vmem:[#allocation2 + $0x40] sm:$0xff]  ;;  %v60_v13 = vld [vmem:[#allocation2 + $0x38] sm:$0xff]  ;;  %v59_v14 = vld [vmem:[#allocation2 + $0x30] sm:$0xff] }
   0xb   :  { %113 = vmatpush.msra.mxu1 %v914_v7  ;;  %176 = vmatpush.msra.mxu2 %v914_v7  ;;  %v58_v15 = vld [vmem:[#allocation2 + $0x28] sm:$0xff]  ;;  %v57_v16 = vld [vmem:[#allocation2 + $0x20] sm:$0xff]  ;;  %v56_v17 = vld [vmem:[#allocation2 + $0x18] sm:$0xff] }
   0xc   :  { %71 = vmatpush.msra.mxu0 %v66_v4  ;;  %246 = vmatpush.msra.mxu3 %v914_v7  ;;  %v55_v18 = vld [vmem:[#allocation2 + $0x10] sm:$0xff]  ;;  %v54_v19 = vld [vmem:[#allocation2 + $0x8] sm:$0xff]  ;;  %v53_v20 = vld [vmem:[#allocation2] sm:$0xff] }
   0xd   :  { %114 = vmatpush.msra.mxu1 %v919_v9  ;;  %177 = vmatpush.msra.mxu2 %v919_v9  ;;  %v932_v21 = vld [vmem:[%s1041_s2] sm:$0xff]  ;;  %s866_s2 = smov 64  }
   0xe   :  { %72 = vmatpush.msra.mxu0 %v65_v5  ;;  %247 = vmatpush.msra.mxu3 %v919_v9 }
   0xf   :  { %115 = vmatpush.msra.mxu1 %v932_v21  ;;  %178 = vmatpush.msra.mxu2 %v932_v21 }
  0x10   :  { %73 = vmatpush.msra.mxu0 %v64_v8  ;;  %116 = vmatmul.f32.vlgmr.msra.gmra.mxu1 %v864_v22 }
  0x11   :  { %248 = vmatpush.msra.mxu3 %v932_v21  ;;  %315 = vmatpush.msrb.mxu1 %v908_v6 }
  0x12   :  { %74 = vmatpush.msra.mxu0 %v63_v10  ;;  %385 = vmatpush.msrb.mxu2 %v908_v6 }
  0x13   :  { %451 = vmatpush.msrb.mxu3 %v908_v6  ;;  %316 = vmatpush.msrb.mxu1 %v914_v7 }
  0x14   :  { %75 = vmatpush.msra.mxu0 %v62_v11  ;;  %386 = vmatpush.msrb.mxu2 %v914_v7 }
  0x15   :  { %452 = vmatpush.msrb.mxu3 %v914_v7  ;;  %317 = vmatpush.msrb.mxu1 %v919_v9 }
  0x16   :  { %76 = vmatpush.msra.mxu0 %v61_v12  ;;  %387 = vmatpush.msrb.mxu2 %v919_v9 }
  0x17   :  { %453 = vmatpush.msrb.mxu3 %v919_v9  ;;  %318 = vmatpush.msrb.mxu1 %v932_v21 }
  0x18   :  { %77 = vmatpush.msra.mxu0 %v60_v13  ;;  %388 = vmatpush.msrb.mxu2 %v932_v21 }
  0x19   :  { %454 = vmatpush.msrb.mxu3 %v932_v21  ;;  %521 = vmatpush.msra.mxu1 %v908_v6 }
  0x1a   :  { %78 = vmatpush.msra.mxu0 %v59_v14 }
  0x1b   :  { %522 = vmatpush.msra.mxu1 %v914_v7 }
  0x1c   :  { %79 = vmatpush.msra.mxu0 %v58_v15 }
  0x1d   :  { %523 = vmatpush.msra.mxu1 %v919_v9 }
  0x1e   :  { %80 = vmatpush.msra.mxu0 %v57_v16 }
  0x1f   :  { %524 = vmatpush.msra.mxu1 %v932_v21 }
  0x20   :  { %81 = vmatpush.msra.mxu0 %v56_v17 }
  0x22   :  { %82 = vmatpush.msra.mxu0 %v55_v18 }
  0x24   :  { %83 = vmatpush.msra.mxu0 %v54_v19 }
  0x26   :  { %84 = vmatpush.msra.mxu0 %v53_v20 }
  0x7a   :  { %v43_v25 = vpop.permute.xlu0 %42 }
  0x7b   :  { %vm47_vm0 = vcmp.eq.s32.totalorder %v43_v25, %v953_v24 }
  0x7c   :  { %710 = vmatmul.msk.f32.vlgmr.msra.gmra.mxu0 %vm47_vm0, %v865_v26 }
  0x8d   :  { %v117_v27 = vpop.f32.mrf.mxu1 }
  0xf9   :  { %v957_v28 = vpop.f32.mrf.mxu0 }
  0xfa   :  { %v120_v29 = vadd.f32 %v117_v27, %v957_v28 }
  0xfc   :  { %740 = vtanh.f32 %v120_v29  ;;  %v712_v31 = vmul.f32 -1.442695, %v120_v29 }
  0xfe   :  { %742 = vpow2.f32 %v712_v31 }
 0x102   :  { %v741_v30 = vpop.eup %740 }
 0x103   :  { %143 = vrot.lane.b32.xlu0 %v741_v30, %s866_s2 }
 0x104   :  { %v743_v32 = vpop.eup %742 }
 0x105   :  { %v124_v33 = vadd.f32 1.0, %v743_v32 }
 0x107   :  { %744 = vrcp.f32 %v124_v33  ;;  %v136_v39 = vand.u32 2147483648, %v124_v33  ;;  %vm130_vm2 = vweird.f32 %v124_v33  ;;  %v134_v40 = vand.u32 2147483647, %v124_v33 }
 0x109   :  { %v137_v42 = vor.u32 1.1754944e-38, %v136_v39  ;;  %vm135_vm4 = vcmp.eq.f32.partialorder %v134_v40, 8.507059e+37 }
 0x10d   :  { %v745_v34 = vpop.eup %744 }
 0x10e   :  { %v126_v35 = vmul.f32 %v745_v34, %v124_v33  ;;  %vm131_vm1 = vweird.f32 %v745_v34 }
 0x10f   :  { %vm132_vm3 = vmor %vm130_vm2, %vm131_vm1 }
 0x110   :  { %v127_v36 = vsub.f32 1.0, %v126_v35 }
 0x112   :  { %v128_v37 = vmul.f32 %v745_v34, %v127_v36 }
 0x114   :  { %v129_v38 = vadd.f32 %v745_v34, %v128_v37 }
 0x116   :  { %v133_v41 = vsel %vm132_vm3, %v745_v34, %v129_v38 }
 0x117   :  { %v138_v44 = vsel %vm135_vm4, %v137_v42, %v133_v41 }
 0x118   :  { %v141_v46 = vmul.f32 0.0, %v138_v44 }
 0x175   :  { %v144_v43 = vpop.permute.xlu0 %143 }
 0x176   :  { %v146_v45 = vmul.f32 %v144_v43, %v138_v44 }
 0x178   :  { %148 = vrot.lane.b32.xlu1 %v146_v45, %s867_s9 }
 0x1ea   :  { %v149_v47 = vpop.permute.xlu1 %148 }
 0x1eb   :  { %v151_v48 = vadd.f32 %v149_v47, %v141_v46 }
 0x1ed   :  { %746 = vtanh.f32 %v151_v48  ;;  %v208_v8 = vrot.slane %v151_v48, 6 }
 0x1f3   :  { %v747_v49 = vpop.eup %746 }
 0x1f4   :  { %154 = vrot.lane.b32.xlu1 %v747_v49, %s866_s2 }
 0x266   :  { %v155_v50 = vpop.permute.xlu1 %154 }
 0x267   :  { %v157_v51 = vmul.f32 %v155_v50, %v138_v44 }
 0x269   :  { %159 = vrot.lane.b32.xlu2 %v157_v51, %s867_s9 }
 0x2c3   :  { %v160_v52 = vpop.permute.xlu2 %159 }
 0x2c4   :  { %713 = vmatmul.msk.f32.vlgmr.msra.gmra.mxu2 %vm96_vm5, %v160_v52 }
 0x2c5   :  { %591 = vmatpush.msra.mxu2 %v908_v6 }
 0x2c7   :  { %592 = vmatpush.msra.mxu2 %v914_v7 }
 0x2c9   :  { %593 = vmatpush.msra.mxu2 %v919_v9 }
 0x2cb   :  { %594 = vmatpush.msra.mxu2 %v932_v21 }
 0x347   :  { %v180_v53 = vpop.f32.mrf.mxu2 }
 0x348   :  { %v184_v54 = vrot.slane %v180_v53, 6 }
 0x34a   :  { %v186_v55 = vadd.f32 %v184_v54, %v957_v28 }
 0x34c   :  { %748 = vtanh.f32 %v186_v55  ;;  %v714_v57 = vmul.f32 -1.442695, %v186_v55 }
 0x34e   :  { %750 = vpow2.f32 %v714_v57 }
 0x352   :  { %v749_v56 = vpop.eup %748 }
 0x353   :  { %212 = vrot.lane.b32.xlu2 %v749_v56, %s866_s2 }
 0x354   :  { %v751_v58 = vpop.eup %750 }
 0x355   :  { %v190_v59 = vadd.f32 1.0, %v751_v58 }
 0x357   :  { %752 = vrcp.f32 %v190_v59  ;;  %v202_v1 = vand.u32 2147483648, %v190_v59  ;;  %vm196_vm7 = vweird.f32 %v190_v59  ;;  %v200_v2 = vand.u32 2147483647, %v190_v59 }
 0x359   :  { %v203_v4 = vor.u32 1.1754944e-38, %v202_v1  ;;  %vm201_vm9 = vcmp.eq.f32.partialorder %v200_v2, 8.507059e+37 }
 0x35d   :  { %v753_v60 = vpop.eup %752 }
 0x35e   :  { %v192_v61 = vmul.f32 %v753_v60, %v190_v59  ;;  %vm197_vm6 = vweird.f32 %v753_v60 }
 0x35f   :  { %vm198_vm8 = vmor %vm196_vm7, %vm197_vm6 }
 0x360   :  { %v193_v62 = vsub.f32 1.0, %v192_v61 }
 0x362   :  { %v194_v63 = vmul.f32 %v753_v60, %v193_v62 }
 0x364   :  { %v195_v0 = vadd.f32 %v753_v60, %v194_v63 }
 0x366   :  { %v199_v3 = vsel %vm198_vm8, %v753_v60, %v195_v0 }
 0x367   :  { %v204_v6 = vsel %vm201_vm9, %v203_v4, %v199_v3 }
 0x368   :  { %v210_v9 = vmul.f32 %v208_v8, %v204_v6 }
 0x3ad   :  { %v213_v5 = vpop.permute.xlu2 %212 }
 0x3ae   :  { %v215_v7 = vmul.f32 %v213_v5, %v204_v6 }
 0x3b0   :  { %217 = vrot.lane.b32.xlu0 %v215_v7, %s867_s9  ;;  %v38_v7 = vld [vmem:[%s1039_s0 + $0x8] sm:$0xff] }
 0x422   :  { %v218_v10 = vpop.permute.xlu0 %217 }
 0x423   :  { %v220_v11 = vadd.f32 %v218_v10, %v210_v9 }
 0x425   :  { %754 = vtanh.f32 %v220_v11  ;;  %v278_v39 = vrot.slane %v220_v11, 6 }
 0x42b   :  { %v755_v12 = vpop.eup %754 }
 0x42c   :  { %223 = vrot.lane.b32.xlu1 %v755_v12, %s866_s2 }
 0x49e   :  { %v224_v13 = vpop.permute.xlu1 %223 }
 0x49f   :  { %v226_v14 = vmul.f32 %v224_v13, %v204_v6 }
 0x4a1   :  { %v228_v15 = vrot.slane %v226_v14, 2 }
 0x4a3   :  { %229 = vrot.lane.b32.xlu2 %v228_v15, %s867_s9 }
 0x4fd   :  { %v230_v16 = vpop.permute.xlu2 %229 }
 0x4fe   :  { %715 = vmatmul.msk.f32.vlgmr.msra.gmra.mxu3 %vm96_vm5, %v230_v16 }
 0x581   :  { %v250_v17 = vpop.f32.mrf.mxu3 }
 0x582   :  { %v254_v18 = vrot.slane %v250_v17, 4 }
 0x584   :  { %v256_v19 = vadd.f32 %v254_v18, %v957_v28 }
 0x586   :  { %756 = vtanh.f32 %v256_v19  ;;  %v716_v21 = vmul.f32 -1.442695, %v256_v19 }
 0x588   :  { %758 = vpow2.f32 %v716_v21 }
 0x58c   :  { %v757_v20 = vpop.eup %756 }
 0x58d   :  { %282 = vrot.lane.b32.xlu0 %v757_v20, %s866_s2 }
 0x58e   :  { %v759_v22 = vpop.eup %758 }
 0x58f   :  { %v260_v23 = vadd.f32 1.0, %v759_v22 }
 0x591   :  { %760 = vrcp.f32 %v260_v23  ;;  %v272_v32 = vand.u32 2147483648, %v260_v23  ;;  %vm266_vm11 = vweird.f32 %v260_v23  ;;  %v270_v33 = vand.u32 2147483647, %v260_v23 }
 0x593   :  { %v273_v35 = vor.u32 1.1754944e-38, %v272_v32  ;;  %vm271_vm13 = vcmp.eq.f32.partialorder %v270_v33, 8.507059e+37 }
 0x597   :  { %v761_v25 = vpop.eup %760 }
 0x598   :  { %v262_v27 = vmul.f32 %v761_v25, %v260_v23  ;;  %vm267_vm10 = vweird.f32 %v761_v25 }
 0x599   :  { %vm268_vm12 = vmor %vm266_vm11, %vm267_vm10 }
 0x59a   :  { %v263_v29 = vsub.f32 1.0, %v262_v27 }
 0x59c   :  { %v264_v30 = vmul.f32 %v761_v25, %v263_v29 }
 0x59e   :  { %v265_v31 = vadd.f32 %v761_v25, %v264_v30 }
 0x5a0   :  { %v269_v34 = vsel %vm268_vm12, %v761_v25, %v265_v31 }
 0x5a1   :  { %v274_v37 = vsel %vm271_vm13, %v273_v35, %v269_v34 }
 0x5a2   :  { %v280_v40 = vmul.f32 %v278_v39, %v274_v37 }
 0x5ff   :  { %v283_v36 = vpop.permute.xlu0 %282 }
 0x600   :  { %v285_v38 = vmul.f32 %v283_v36, %v274_v37 }
 0x602   :  { %287 = vrot.lane.b32.xlu1 %v285_v38, %s867_s9 }
 0x674   :  { %v288_v41 = vpop.permute.xlu1 %287 }
 0x675   :  { %v290_v42 = vadd.f32 %v288_v41, %v280_v40 }
 0x677   :  { %762 = vtanh.f32 %v290_v42  ;;  %v348_v2 = vrot.slane %v290_v42, 6 }
 0x67d   :  { %v763_v43 = vpop.eup %762 }
 0x67e   :  { %293 = vrot.lane.b32.xlu2 %v763_v43, %s866_s2 }
 0x6d8   :  { %v294_v44 = vpop.permute.xlu2 %293 }
 0x6d9   :  { %v296_v45 = vmul.f32 %v294_v44, %v274_v37 }
 0x6db   :  { %v298_v46 = vrot.slane %v296_v45, 4 }
 0x6dd   :  { %299 = vrot.lane.b32.xlu0 %v298_v46, %s867_s9 }
 0x74f   :  { %v300_v47 = vpop.permute.xlu0 %299 }
 0x750   :  { %717 = vmatmul.msk.f32.vlgmr.msrb.gmra.mxu1 %vm96_vm5, %v300_v47 }
 0x7cd   :  { %v320_v48 = vpop.f32.mrf.mxu1 }
 0x7ce   :  { %v324_v49 = vrot.slane %v320_v48, 2 }
 0x7d0   :  { %v326_v50 = vadd.f32 %v324_v49, %v957_v28 }
 0x7d2   :  { %764 = vtanh.f32 %v326_v50  ;;  %v718_v52 = vmul.f32 -1.442695, %v326_v50 }
 0x7d4   :  { %766 = vpow2.f32 %v718_v52 }
 0x7d8   :  { %v765_v51 = vpop.eup %764 }
 0x7d9   :  { %352 = vrot.lane.b32.xlu1 %v765_v51, %s866_s2 }
 0x7da   :  { %v767_v53 = vpop.eup %766 }
 0x7db   :  { %v330_v54 = vadd.f32 1.0, %v767_v53 }
 0x7dd   :  { %768 = vrcp.f32 %v330_v54  ;;  %v342_v60 = vand.u32 2147483648, %v330_v54  ;;  %vm336_vm15 = vweird.f32 %v330_v54  ;;  %v340_v61 = vand.u32 2147483647, %v330_v54 }
 0x7df   :  { %v343_v62 = vor.u32 1.1754944e-38, %v342_v60  ;;  %vm341_vm1 = vcmp.eq.f32.partialorder %v340_v61, 8.507059e+37 }
 0x7e3   :  { %v769_v55 = vpop.eup %768 }
 0x7e4   :  { %v332_v56 = vmul.f32 %v769_v55, %v330_v54  ;;  %vm337_vm14 = vweird.f32 %v769_v55 }
 0x7e5   :  { %vm338_vm0 = vmor %vm336_vm15, %vm337_vm14 }
 0x7e6   :  { %v333_v57 = vsub.f32 1.0, %v332_v56 }
 0x7e8   :  { %v334_v58 = vmul.f32 %v769_v55, %v333_v57 }
 0x7ea   :  { %v335_v59 = vadd.f32 %v769_v55, %v334_v58 }
 0x7ec   :  { %v339_v28 = vsel %vm338_vm0, %v769_v55, %v335_v59 }
 0x7ed   :  { %v344_v0 = vsel %vm341_vm1, %v343_v62, %v339_v28 }
 0x7ee   :  { %v350_v3 = vmul.f32 %v348_v2, %v344_v0 }
 0x84b   :  { %v353_v63 = vpop.permute.xlu1 %352 }
 0x84c   :  { %v355_v1 = vmul.f32 %v353_v63, %v344_v0 }
 0x84e   :  { %357 = vrot.lane.b32.xlu2 %v355_v1, %s867_s9 }
 0x856   :  { %45 = vperm.xlu2 %738, %v38_v7  }
 0x8a8   :  { %v358_v4 = vpop.permute.xlu2 %357 }
 0x8a9   :  { %v360_v5 = vadd.f32 %v358_v4, %v350_v3 }
 0x8ab   :  { %770 = vtanh.f32 %v360_v5  ;;  %v415_v33 = vrot.slane %v360_v5, 6 }
 0x8b0   :  { %v46_v11 = vpop.permute.xlu2 %45 }
 0x8b1   :  { %v771_v6 = vpop.eup %770  ;;  %vm48_vm2 = vcmp.eq.s32.totalorder %v46_v11, %v953_v24 }
 0x8b2   :  { %363 = vrot.lane.b32.xlu0 %v771_v6, %s866_s2  ;;  %711 = vmatmul.msk.f32.gmra.mxu0 %vm48_vm2, %v865_v26 }
 0x924   :  { %v364_v8 = vpop.permute.xlu0 %363 }
 0x925   :  { %v366_v9 = vmul.f32 %v364_v8, %v344_v0 }
 0x927   :  { %v368_v10 = vrot.slane %v366_v9, 6 }
 0x929   :  { %369 = vrot.lane.b32.xlu1 %v368_v10, %s867_s9 }
 0x92f   :  { %v992_v13 = vpop.f32.mrf.mxu0 }
 0x99b   :  { %v370_v12 = vpop.permute.xlu1 %369 }
 0x99c   :  { %719 = vmatmul.msk.f32.vlgmr.msrb.gmra.mxu2 %vm96_vm5, %v370_v12 }
 0xa1f   :  { %v390_v14 = vpop.f32.mrf.mxu2 }
 0xa20   :  { %v393_v15 = vadd.f32 %v390_v14, %v992_v13 }
 0xa22   :  { %772 = vtanh.f32 %v393_v15  ;;  %v720_v17 = vmul.f32 -1.442695, %v393_v15 }
 0xa24   :  { %774 = vpow2.f32 %v720_v17 }
 0xa28   :  { %v773_v16 = vpop.eup %772 }
 0xa29   :  { %419 = vrot.lane.b32.xlu0 %v773_v16, %s866_s2 }
 0xa2a   :  { %v775_v18 = vpop.eup %774 }
 0xa2b   :  { %v397_v19 = vadd.f32 1.0, %v775_v18 }
 0xa2d   :  { %776 = vrcp.f32 %v397_v19  ;;  %v409_v23 = vand.u32 2147483648, %v397_v19  ;;  %vm403_vm4 = vweird.f32 %v397_v19  ;;  %v407_v25 = vand.u32 2147483647, %v397_v19 }
 0xa2f   :  { %v410_v29 = vor.u32 1.1754944e-38, %v409_v23  ;;  %vm408_vm7 = vcmp.eq.f32.partialorder %v407_v25, 8.507059e+37 }
 0xa33   :  { %v777_v24 = vpop.eup %776 }
 0xa34   :  { %v399_v20 = vmul.f32 %v777_v24, %v397_v19  ;;  %vm404_vm3 = vweird.f32 %v777_v24 }
 0xa35   :  { %vm405_vm6 = vmor %vm403_vm4, %vm404_vm3  ;;  %vm677_vm4 = vcmask 58368  }
 0xa36   :  { %v400_v26 = vsub.f32 1.0, %v399_v20 }
 0xa38   :  { %v401_v21 = vmul.f32 %v777_v24, %v400_v26 }
 0xa3a   :  { %v402_v22 = vadd.f32 %v777_v24, %v401_v21 }
 0xa3c   :  { %v406_v27 = vsel %vm405_vm6, %v777_v24, %v402_v22 }
 0xa3d   :  { %v411_v31 = vsel %vm408_vm7, %v410_v29, %v406_v27 }
 0xa3e   :  { %v417_v34 = vmul.f32 %v415_v33, %v411_v31 }
 0xa9b   :  { %v420_v30 = vpop.permute.xlu0 %419 }
 0xa9c   :  { %v422_v32 = vmul.f32 %v420_v30, %v411_v31 }
 0xa9e   :  { %424 = vrot.lane.b32.xlu1 %v422_v32, %s867_s9 }
 0xb10   :  { %v425_v35 = vpop.permute.xlu1 %424 }
 0xb11   :  { %v427_v36 = vadd.f32 %v425_v35, %v417_v34 }
 0xb13   :  { %778 = vtanh.f32 %v427_v36  ;;  %v484_v60 = vrot.slane %v427_v36, 6 }
 0xb19   :  { %v779_v37 = vpop.eup %778 }
 0xb1a   :  { %430 = vrot.lane.b32.xlu2 %v779_v37, %s866_s2 }
 0xb74   :  { %v431_v38 = vpop.permute.xlu2 %430 }
 0xb75   :  { %v433_v39 = vmul.f32 %v431_v38, %v411_v31 }
 0xb77   :  { %435 = vrot.lane.b32.xlu0 %v433_v39, %s867_s9 }
 0xbe9   :  { %v436_v40 = vpop.permute.xlu0 %435 }
 0xbea   :  { %721 = vmatmul.msk.f32.vlgmr.msrb.gmra.mxu3 %vm96_vm5, %v436_v40 }
 0xc6d   :  { %v456_v41 = vpop.f32.mrf.mxu3 }
 0xc6e   :  { %v460_v42 = vrot.slane %v456_v41, 6 }
 0xc70   :  { %v462_v43 = vadd.f32 %v460_v42, %v992_v13 }
 0xc72   :  { %780 = vtanh.f32 %v462_v43  ;;  %v722_v45 = vmul.f32 -1.442695, %v462_v43 }
 0xc74   :  { %782 = vpow2.f32 %v722_v45 }
 0xc78   :  { %v781_v44 = vpop.eup %780 }
 0xc79   :  { %488 = vrot.lane.b32.xlu1 %v781_v44, %s866_s2 }
 0xc7a   :  { %v783_v46 = vpop.eup %782 }
 0xc7b   :  { %v466_v47 = vadd.f32 1.0, %v783_v46 }
 0xc7d   :  { %784 = vrcp.f32 %v466_v47  ;;  %v478_v53 = vand.u32 2147483648, %v466_v47  ;;  %vm472_vm9 = vweird.f32 %v466_v47  ;;  %v476_v54 = vand.u32 2147483647, %v466_v47 }
 0xc7f   :  { %v479_v56 = vor.u32 1.1754944e-38, %v478_v53  ;;  %vm477_vm11 = vcmp.eq.f32.partialorder %v476_v54, 8.507059e+37 }
 0xc83   :  { %v785_v48 = vpop.eup %784 }
 0xc84   :  { %v468_v49 = vmul.f32 %v785_v48, %v466_v47  ;;  %vm473_vm8 = vweird.f32 %v785_v48 }
 0xc85   :  { %vm474_vm10 = vmor %vm472_vm9, %vm473_vm8 }
 0xc86   :  { %v469_v50 = vsub.f32 1.0, %v468_v49 }
 0xc88   :  { %v470_v51 = vmul.f32 %v785_v48, %v469_v50 }
 0xc8a   :  { %v471_v52 = vadd.f32 %v785_v48, %v470_v51 }
 0xc8c   :  { %v475_v55 = vsel %vm474_vm10, %v785_v48, %v471_v52 }
 0xc8d   :  { %v480_v58 = vsel %vm477_vm11, %v479_v56, %v475_v55 }
 0xc8e   :  { %v486_v61 = vmul.f32 %v484_v60, %v480_v58  ;;  %v643_v60 = vld [vmem:[%s1042_s3] sm:$0xff] }
 0xceb   :  { %v489_v57 = vpop.permute.xlu1 %488 }
 0xcec   :  { %v491_v59 = vmul.f32 %v489_v57, %v480_v58  ;;  %v646_v57 = vld [vmem:[%s1042_s3 + $0x18] sm:$0xff] }
 0xced   :  { %669 = vmatpush.msra.mxu3 %v646_v57 }
 0xcee   :  { %493 = vrot.lane.b32.xlu2 %v491_v59, %s867_s9  ;;  %v644_v59 = vld [vmem:[%s1042_s3 + $0x8] sm:$0xff] }
 0xd48   :  { %v494_v28 = vpop.permute.xlu2 %493 }
 0xd49   :  { %v496_v62 = vadd.f32 %v494_v28, %v486_v61 }
 0xd4b   :  { %786 = vtanh.f32 %v496_v62  ;;  %v554_v22 = vrot.slane %v496_v62, 6 }
 0xd51   :  { %v787_v63 = vpop.eup %786 }
 0xd52   :  { %499 = vrot.lane.b32.xlu0 %v787_v63, %s866_s2 }
 0xdc4   :  { %v500_v0 = vpop.permute.xlu0 %499 }
 0xdc5   :  { %v502_v1 = vmul.f32 %v500_v0, %v480_v58  ;;  %v645_v58 = vld [vmem:[%s1042_s3 + $0x10] sm:$0xff]  ;;  %v739_v0 = vld [vmem:[%s1043_s4] ss:$0 sm:$0xff]  ;;  %s868_s3 = smov [#allocation5]  }
 0xdc6   :  { %670 = vmatpush.msra.mxu3 %v645_v58  ;;  %s696_s21 = sshll.u32 %s868_s3, 4  ;;  %s697_s21 = int_to_ptr.vmem [resolvable:$true] %s696_s21 }
 0xdc7   :  { %v504_v2 = vrot.slane %v502_v1, 2 }
 0xdc8   :  { %671 = vmatpush.msra.mxu3 %v644_v59 }
 0xdc9   :  { %505 = vrot.lane.b32.xlu1 %v504_v2, %s867_s9 }
 0xdca   :  { %672 = vmatpush.msra.mxu3 %v643_v60 }
 0xe3b   :  { %v506_v3 = vpop.permute.xlu1 %505 }
 0xe3c   :  { %723 = vmatmul.msk.f32.vlgmr.msra.gmra.mxu1 %vm96_vm5, %v506_v3 }
 0xeb9   :  { %v526_v4 = vpop.f32.mrf.mxu1 }
 0xeba   :  { %v530_v5 = vrot.slane %v526_v4, 4 }
 0xebc   :  { %v532_v6 = vadd.f32 %v530_v5, %v992_v13 }
 0xebe   :  { %788 = vtanh.f32 %v532_v6  ;;  %v724_v8 = vmul.f32 -1.442695, %v532_v6 }
 0xec0   :  { %790 = vpow2.f32 %v724_v8 }
 0xec4   :  { %v789_v7 = vpop.eup %788 }
 0xec5   :  { %558 = vrot.lane.b32.xlu2 %v789_v7, %s866_s2 }
 0xec6   :  { %v791_v9 = vpop.eup %790 }
 0xec7   :  { %v536_v10 = vadd.f32 1.0, %v791_v9 }
 0xec9   :  { %792 = vrcp.f32 %v536_v10  ;;  %v548_v17 = vand.u32 2147483648, %v536_v10  ;;  %vm542_vm13 = vweird.f32 %v536_v10  ;;  %v546_v18 = vand.u32 2147483647, %v536_v10 }
 0xecb   :  { %v549_v24 = vor.u32 1.1754944e-38, %v548_v17  ;;  %vm547_vm15 = vcmp.eq.f32.partialorder %v546_v18, 8.507059e+37 }
 0xecf   :  { %v793_v11 = vpop.eup %792 }
 0xed0   :  { %v538_v12 = vmul.f32 %v793_v11, %v536_v10  ;;  %vm543_vm12 = vweird.f32 %v793_v11 }
 0xed1   :  { %vm544_vm14 = vmor %vm542_vm13, %vm543_vm12 }
 0xed2   :  { %v539_v14 = vsub.f32 1.0, %v538_v12 }
 0xed4   :  { %v540_v15 = vmul.f32 %v793_v11, %v539_v14 }
 0xed6   :  { %v541_v16 = vadd.f32 %v793_v11, %v540_v15 }
 0xed8   :  { %v545_v19 = vsel %vm544_vm14, %v793_v11, %v541_v16 }
 0xed9   :  { %v550_v26 = vsel %vm547_vm15, %v549_v24, %v545_v19 }
 0xeda   :  { %v556_v23 = vmul.f32 %v554_v22, %v550_v26 }
 0xf1f   :  { %v559_v20 = vpop.permute.xlu2 %558 }
 0xf20   :  { %v561_v21 = vmul.f32 %v559_v20, %v550_v26 }
 0xf22   :  { %563 = vrot.lane.b32.xlu0 %v561_v21, %s867_s9 }
 0xf94   :  { %v564_v25 = vpop.permute.xlu0 %563 }
 0xf95   :  { %v566_v27 = vadd.f32 %v564_v25, %v556_v23 }
 0xf97   :  { %794 = vtanh.f32 %v566_v27  ;;  %v624_v52 = vrot.slane %v566_v27, 6 }
 0xf9d   :  { %v795_v29 = vpop.eup %794 }
 0xf9e   :  { %569 = vrot.lane.b32.xlu1 %v795_v29, %s866_s2 }
0x1010   :  { %v570_v30 = vpop.permute.xlu1 %569 }
0x1011   :  { %v572_v31 = vmul.f32 %v570_v30, %v550_v26 }
0x1013   :  { %v574_v32 = vrot.slane %v572_v31, 4 }
0x1015   :  { %575 = vrot.lane.b32.xlu2 %v574_v32, %s867_s9 }
0x106f   :  { %v576_v33 = vpop.permute.xlu2 %575 }
0x1070   :  { %725 = vmatmul.msk.f32.vlgmr.msra.gmra.mxu2 %vm96_vm5, %v576_v33 }
0x10f3   :  { %v596_v34 = vpop.f32.mrf.mxu2 }
0x10f4   :  { %v600_v35 = vrot.slane %v596_v34, 2 }
0x10f6   :  { %v602_v36 = vadd.f32 %v600_v35, %v992_v13 }
0x10f8   :  { %796 = vtanh.f32 %v602_v36  ;;  %v726_v38 = vmul.f32 -1.442695, %v602_v36 }
0x10fa   :  { %798 = vpow2.f32 %v726_v38 }
0x10fe   :  { %v797_v37 = vpop.eup %796 }
0x10ff   :  { %628 = vrot.lane.b32.xlu0 %v797_v37, %s866_s2 }
0x1100   :  { %v799_v39 = vpop.eup %798 }
0x1101   :  { %v606_v40 = vadd.f32 1.0, %v799_v39 }
0x1103   :  { %800 = vrcp.f32 %v606_v40  ;;  %v618_v46 = vand.u32 2147483648, %v606_v40  ;;  %vm612_vm1 = vweird.f32 %v606_v40  ;;  %v616_v47 = vand.u32 2147483647, %v606_v40 }
0x1105   :  { %v619_v48 = vor.u32 1.1754944e-38, %v618_v46  ;;  %vm617_vm3 = vcmp.eq.f32.partialorder %v616_v47, 8.507059e+37 }
0x1109   :  { %v801_v41 = vpop.eup %800 }
0x110a   :  { %v608_v42 = vmul.f32 %v801_v41, %v606_v40  ;;  %vm613_vm0 = vweird.f32 %v801_v41 }
0x110b   :  { %vm614_vm2 = vmor %vm612_vm1, %vm613_vm0 }
0x110c   :  { %v609_v43 = vsub.f32 1.0, %v608_v42 }
0x110e   :  { %v610_v44 = vmul.f32 %v801_v41, %v609_v43 }
0x1110   :  { %v611_v45 = vadd.f32 %v801_v41, %v610_v44 }
0x1112   :  { %v615_v13 = vsel %vm614_vm2, %v801_v41, %v611_v45 }
0x1113   :  { %v620_v50 = vsel %vm617_vm3, %v619_v48, %v615_v13 }
0x1114   :  { %v626_v53 = vmul.f32 %v624_v52, %v620_v50 }
0x1171   :  { %v629_v49 = vpop.permute.xlu0 %628 }
0x1172   :  { %v631_v51 = vmul.f32 %v629_v49, %v620_v50 }
0x1174   :  { %633 = vrot.lane.b32.xlu1 %v631_v51, %s867_s9 }
0x11e6   :  { %v634_v54 = vpop.permute.xlu1 %633 }
0x11e7   :  { %v636_v55 = vadd.f32 %v634_v54, %v626_v53 }
0x11e9   :  { %802 = vtanh.f32 %v636_v55 }
0x11ef   :  { %v803_v56 = vpop.eup %802 }
0x11f0   :  { %639 = vrot.lane.b32.xlu2 %v803_v56, %s866_s2 }
0x124a   :  { %v640_v61 = vpop.permute.xlu2 %639 }
0x124b   :  { %v642_v28 = vmul.f32 %v640_v61, %v620_v50 }
0x124d   :  { %v652_v62 = vrot.slane %v642_v28, 6 }
0x124f   :  { %653 = vrot.lane.b32.xlu0 %v652_v62, %s867_s9 }
0x12c1   :  { %v654_v63 = vpop.permute.xlu0 %653 }
0x12c2   :  { %727 = vmatmul.msk.f32.vlgmr.msra.gmra.mxu3 %vm96_vm5, %v654_v63 }
0x1345   :  { %v674_v1 = vpop.f32.mrf.mxu3 }
0x1346   :  { %v675_v2 = vadd.f32 %v739_v0, %v674_v1 }
0x1348   :  { %v678_v3 = vsel %vm677_vm4, %v675_v2, -inf }
0x1349   :  { %679 = vmax.xlane.f32.xlu1 %v678_v3 }
0x13bc   :  { %v680_v4 = vpop.xlane.xlu1 %679 }
0x13bd   :  { %v681_v5 = vsub.f32 %v675_v2, %v680_v4 }
0x13bf   :  { %v682_v6 = vmul.f32 1.442695, %v681_v5 }
0x13c1   :  { %804 = vpow2.f32 %v682_v6 }
0x13c7   :  { %v805_v7 = vpop.eup %804 }
0x13c8   :  { %v684_v8 = vsel %vm677_vm4, %v805_v7, 0.0 }
0x13c9   :  { %685 = vadd.xlane.f32.xlu2 %v684_v8 }
0x143c   :  { %v686_v9 = vpop.xlane.xlu2 %685 }
0x143d   :  { %806 = vlog2.f32 %v686_v9 }
0x1443   :  { %v807_v10 = vpop.eup %806 }
0x1444   :  { %v688_v11 = vmul.f32 0.6931472, %v807_v10 }
0x1446   :  { %v689_v12 = vsub.f32 %v681_v5, %v688_v11 }
0x1448   :  { %690 = vst.msk [vmem:[#allocation5] sm:$0x3] %vm677_vm4, %v689_v12 }
0x1449   :  { %701 = dma.vmem_to_hbm [thread:$0]  %s697_s21, 32, %s699_s23, [#allocation4]  }
0x144a   :  { %858 = dma.done.wait [#allocation4], 32  }
0x144b   :  { %859 = vsyncadd [#allocation4], 4294967264 }
0x144c   :  { %706 = vsyncpa [#allocation3], 1 }
0x144d   :  { %707 = vsyncpa [#allocation4], 1 }

</bundles_post_ra>
